<compile_context>
chip_gen: v5e
topology: v5e:2x2
jax: 0.10.0
libtpu: 0.0.40
codegen_flags: <defaults>
</compile_context>

<pallas_src>
import functools

import jax
import jax.numpy as jnp
from jax.experimental import pallas as pl
from jax.experimental.pallas import tpu as pltpu


# ---------------------------------------------------------------------------
# Kernel
# ---------------------------------------------------------------------------
def _qnet_kernel(sel_ref, xt_ref, w1t_ref, b1_ref, w2t_ref, b2_ref,
                 w3t_ref, b3_ref, out_ref):
    """3-layer MLP on one transposed batch tile (features on sublanes, batch on lanes).

    xt : (S, TB)  bf16            w1t: (H, S)  bf16    b1: (H, 1) f32
    w2t: (H, H)   bf16 (branch)   b2 : (H, 1)  f32     (branch)
    w3t: (P, H)   bf16 (branch)   b3 : (P, 1)  f32     (branch, P = action_size padded to 8)
    out: (P, TB)  f32
    sel_ref (SMEM scalar prefetch) is consumed only by the weight index_maps.
    """
    del sel_ref
    xt = xt_ref[...]
    # fc1 -> relu (f32 accumulate on the MXU output, bias broadcast over lanes)
    h = jnp.dot(w1t_ref[...], xt, preferred_element_type=jnp.float32) + b1_ref[...]
    h = jnp.maximum(h, 0.0).astype(xt.dtype)
    # fc2_{branch} -> relu
    h = jnp.dot(w2t_ref[...], h, preferred_element_type=jnp.float32) + b2_ref[...]
    h = jnp.maximum(h, 0.0).astype(xt.dtype)
    # fc3_{branch}
    out_ref[...] = (
        jnp.dot(w3t_ref[...], h, preferred_element_type=jnp.float32) + b3_ref[...]
    )


def qnetwork_pallas(x, packed, sel, *, action_size, block_b=2048):
    """Run the packed QNetwork MLP. x: (B, state_size) f32 -> (B, action_size) f32."""
    w1t, b1, w2t, b2, w3t, b3 = packed
    B, S = x.shape
    H = w1t.shape[0]
    P = w3t.shape[1]            # action_size padded up to a multiple of 8 sublanes

    # Batch on the lane axis; bf16 for the MXU.
    xt = x.astype(w1t.dtype).T  # (S, B)

    # Single full-extent tile for typical batches (grid=(1,), no pad, no dual-TC
    # sharding of a latency-bound kernel); tile only very large batches.
    TB = B if B <= block_b else block_b
    Bp = pl.cdiv(B, TB) * TB
    if Bp != B:
        xt = jnp.pad(xt, ((0, 0), (0, Bp - B)))
    grid = (Bp // TB,)

    out_t = pl.pallas_call(
        _qnet_kernel,
        out_shape=jax.ShapeDtypeStruct((P, Bp), jnp.float32),
        grid_spec=pltpu.PrefetchScalarGridSpec(
            num_scalar_prefetch=1,
            grid=grid,
            in_specs=[
                # x^T: tiled over batch (lane axis).
                pl.BlockSpec((S, TB), lambda i, s: (0, i)),
                # fc1 weight/bias: constant blocks -> VMEM-resident across steps.
                pl.BlockSpec((H, S), lambda i, s: (0, 0)),
                pl.BlockSpec((H, 1), lambda i, s: (0, 0)),
                # fc2 / fc3 stacks: branch picked via scalar-prefetched indices.
                pl.BlockSpec((None, H, H), lambda i, s: (s[0], 0, 0)),
                pl.BlockSpec((None, H, 1), lambda i, s: (s[0], 0, 0)),
                pl.BlockSpec((None, P, H), lambda i, s: (s[1], 0, 0)),
                pl.BlockSpec((None, P, 1), lambda i, s: (s[1], 0, 0)),
            ],
            out_specs=pl.BlockSpec((P, TB), lambda i, s: (0, i)),
        ),
        compiler_params=pltpu.CompilerParams(
            # Only matters when grid > 1 (large batches): lets v7x shard tiles.
            dimension_semantics=("parallel",),
        ),
    )(sel, xt, w1t, b1, w2t, b2, w3t, b3)

    return out_t[:action_size, :B].T


# ---------------------------------------------------------------------------
# Parameter construction / packing
# ---------------------------------------------------------------------------
def init_linear(key, in_features, out_features):
    """PyTorch nn.Linear-style init: U(-1/sqrt(fan_in), 1/sqrt(fan_in)).

    Weight stored as [in, out] so the f32 reference computes x @ W + b."""
    kw, kb = jax.random.split(key)
    bound = 1.0 / (in_features ** 0.5)
    w = jax.random.uniform(kw, (in_features, out_features), jnp.float32, -bound, bound)
    b = jax.random.uniform(kb, (out_features,), jnp.float32, -bound, bound)
    return w, b


def init_qnetwork_params(state_size, action_size, hidden_size, key):
    k1, k2, k3, k4, k5 = jax.random.split(key, 5)
    return {
        "fc1": init_linear(k1, state_size, hidden_size),
        "fc2_q_learning": init_linear(k2, hidden_size, hidden_size),
        "fc3_q_learning": init_linear(k3, hidden_size, action_size),
        "fc2_sarsa": init_linear(k4, hidden_size, hidden_size),
        "fc3_sarsa": init_linear(k5, hidden_size, action_size),
    }


def pack_qnetwork_params(params, weight_dtype=jnp.bfloat16):
    """Pack the 5 Linear layers for the batch-on-lanes kernel.

    Weights are transposed to (out, in) and cast to bf16; biases are (out, 1)
    f32 columns; the fc3 output dim is zero-padded to a multiple of 8 sublanes.
    Returns ((w1t, b1, w2t_stack, b2_stack, w3t_stack, b3_stack), action_size)."""
    def wt(p):
        return p[0].T.astype(weight_dtype)       # (out, in)

    def bc(p):
        return p[1][:, None].astype(jnp.float32)  # (out, 1)

    action_size = params["fc3_q_learning"][0].shape[1]
    P = max(8, ((action_size + 7) // 8) * 8)
    pad = P - action_size

    w1t = wt(params["fc1"])                                              # (H, S)
    b1 = bc(params["fc1"])                                               # (H, 1)
    w2t = jnp.stack([wt(params["fc2_q_learning"]), wt(params["fc2_sarsa"])])   # (2,H,H)
    b2 = jnp.stack([bc(params["fc2_q_learning"]), bc(params["fc2_sarsa"])])    # (2,H,1)
    w3t = jnp.stack([
        jnp.pad(wt(params["fc3_q_learning"]), ((0, pad), (0, 0))),
        jnp.pad(wt(params["fc3_sarsa"]), ((0, pad), (0, 0))),
    ])                                                                   # (2,P,H)
    b3 = jnp.stack([
        jnp.pad(bc(params["fc3_q_learning"]), ((0, pad), (0, 0))),
        jnp.pad(bc(params["fc3_sarsa"]), ((0, pad), (0, 0))),
    ])                                                                   # (2,P,1)
    return (w1t, b1, w2t, b2, w3t, b3), action_size


# ---------------------------------------------------------------------------
# Forward (flag glue mirrors QNetwork.forward; the MLP runs in the kernel)
# ---------------------------------------------------------------------------
def branch_indices(multi_controller=False, multi_controller_v2=False,
                   student_type="q_learning"):
    """Map the module's flags to (fc2_branch, fc3_branch): 0=q_learning, 1=sarsa."""
    if multi_controller:
        if multi_controller_v2:
            # multi_controller_forward2: fc2 is always q_learning, fc3 by student.
            return (0, 0 if student_type == "q_learning" else 1)
        # multi_controller_forward: whole branch chosen by student_type.
        b = 0 if student_type == "q_learning" else 1
        return (b, b)
    # vanilla_forward
    return (0, 0)


@functools.partial(jax.jit, static_argnames=("action_size", "block_b"))
def qnetwork_apply(packed, state, sel, *, action_size, block_b=2048):
    return qnetwork_pallas(state, packed, sel, action_size=action_size,
                           block_b=block_b)


def qnetwork_forward(packed, state, *, action_size, multi_controller=False,
                     multi_controller_v2=False, student_type="q_learning"):
    """Mirrors QNetwork.forward: one jitted call / one pallas_call; the branch is
    a runtime scalar so every flavour shares the same compiled kernel."""
    sel = jnp.asarray(
        branch_indices(multi_controller, multi_controller_v2, student_type),
        dtype=jnp.int32,
    )
    return qnetwork_apply(packed, state, sel, action_size=action_size)


# ---------------------------------------------------------------------------
# Reference + demo
# ---------------------------------------------------------------------------
def reference_forward(params, state, *, multi_controller=False,
                      multi_controller_v2=False, student_type="q_learning"):
    def lin(p, x):
        w, b = p
        return x @ w + b

    h = jnp.maximum(lin(params["fc1"], state), 0.0)
    if multi_controller and not multi_controller_v2:
        if student_type == "q_learning":
            h = jnp.maximum(lin(params["fc2_q_learning"], h), 0.0)
            return lin(params["fc3_q_learning"], h)
        h = jnp.maximum(lin(params["fc2_sarsa"], h), 0.0)
        return lin(params["fc3_sarsa"], h)
    h = jnp.maximum(lin(params["fc2_q_learning"], h), 0.0)
    if multi_controller and multi_controller_v2 and student_type != "q_learning":
        return lin(params["fc3_sarsa"], h)
    return lin(params["fc3_q_learning"], h)


if __name__ == "__main__":
    # Small shapes implied by the module: state vector -> hidden -> action values.
    batch = 2
    state_size = 8
    action_size = 4
    hidden_size = 32

    key = jax.random.PRNGKey(0)
    k_params, k_state, k_big, k_huge = jax.random.split(key, 4)

    params = init_qnetwork_params(state_size, action_size, hidden_size, k_params)
    packed, act = pack_qnetwork_params(params)
    assert act == action_size

    state = jax.random.normal(k_state, (batch, state_size), dtype=jnp.float32)

    # bf16 matmul inputs (f32 accumulation) -> loosened tolerances vs f32 reference.
    ATOL = 5e-2
    RTOL = 5e-2

    flavours = {
        "vanilla": dict(),
        "mc_q_learning": dict(multi_controller=True, student_type="q_learning"),
        "mc_sarsa": dict(multi_controller=True, student_type="sarsa"),
        "mc_v2_sarsa": dict(multi_controller=True, multi_controller_v2=True,
                            student_type="sarsa"),
    }

    for name, flags in flavours.items():
        out = qnetwork_forward(packed, state, action_size=action_size, **flags)
        out = jax.block_until_ready(out)
        ref = reference_forward(params, state, **flags)
        assert out.shape == (batch, action_size), name
        assert jnp.allclose(out, ref, atol=ATOL, rtol=RTOL), name

    # Lane-dense single-tile path: batch on lanes, grid=(1,).
    big_batch = 512
    big_state = jax.random.normal(k_big, (big_batch, state_size), dtype=jnp.float32)
    out_big = qnetwork_forward(
        packed, big_state, action_size=action_size,
        multi_controller=True, student_type="sarsa",
    )
    out_big = jax.block_until_ready(out_big)
    ref_big = reference_forward(
        params, big_state, multi_controller=True, student_type="sarsa"
    )
    assert out_big.shape == (big_batch, action_size)
    assert jnp.allclose(out_big, ref_big, atol=ATOL, rtol=RTOL)

    # Multi-tile path: batch > block_b -> grid=(2,), "parallel" batch-tile axis.
    huge_batch = 4096
    huge_state = jax.random.normal(k_huge, (huge_batch, state_size), dtype=jnp.float32)
    out_huge = qnetwork_forward(packed, huge_state, action_size=action_size)
    out_huge = jax.block_until_ready(out_huge)
    ref_huge = reference_forward(params, huge_state)
    assert out_huge.shape == (huge_batch, action_size)
    assert jnp.allclose(out_huge, ref_huge, atol=ATOL, rtol=RTOL)

    # TODO(synk): the PyTorch module's print() logging inside forward has no
    # kernel equivalent and is intentionally omitted.
    print("KERNEL_OK")
</pallas_src>

<mosaic_0001>
module attributes {stable_mosaic.version = 11 : i64} {
  func.func @_qnet_kernel(%arg0: i32, %arg1: memref<2xi32, #tpu.memory_space<smem>>, %arg2: memref<8x2xbf16, #tpu.memory_space<vmem>>, %arg3: memref<32x8xbf16, #tpu.memory_space<vmem>>, %arg4: memref<32x1xf32, #tpu.memory_space<vmem>>, %arg5: memref<1x32x32xbf16, #tpu.memory_space<vmem>>, %arg6: memref<1x32x1xf32, #tpu.memory_space<vmem>>, %arg7: memref<1x8x32xbf16, #tpu.memory_space<vmem>>, %arg8: memref<1x8x1xf32, #tpu.memory_space<vmem>>, %arg9: memref<8x2xf32, #tpu.memory_space<vmem>>) attributes {dimension_semantics = [#tpu.dimension_semantics<parallel>], iteration_bounds = array<i64: 1>, scalar_prefetch = 1 : i64, scratch_operands = 0 : i64, tpu.core_type = #tpu.core_type<tc>, window_params = [{transform_indices = @transform_0, window_bounds = array<i64: 8, 2>}, {pipeline_mode = #tpu.pipeline_mode<synchronous>, transform_indices = @transform_1, window_bounds = array<i64: 32, 8>}, {pipeline_mode = #tpu.pipeline_mode<synchronous>, transform_indices = @transform_2, window_bounds = array<i64: 32, 1>}, {transform_indices = @transform_3, window_bounds = array<i64: 1, 32, 32>}, {transform_indices = @transform_4, window_bounds = array<i64: 1, 32, 1>}, {transform_indices = @transform_5, window_bounds = array<i64: 1, 8, 32>}, {transform_indices = @transform_6, window_bounds = array<i64: 1, 8, 1>}, {transform_indices = @transform_7, window_bounds = array<i64: 8, 2>}]} {
    %c0 = arith.constant 0 : index
    %c0_0 = arith.constant 0 : index
    %0 = vector.load %arg2[%c0, %c0_0] : memref<8x2xbf16, #tpu.memory_space<vmem>>, vector<8x2xbf16>
    %c0_1 = arith.constant 0 : index
    %c0_2 = arith.constant 0 : index
    %1 = vector.load %arg3[%c0_1, %c0_2] : memref<32x8xbf16, #tpu.memory_space<vmem>>, vector<32x8xbf16>
    %cst = arith.constant dense<0.000000e+00> : vector<32x2xf32>
    %2 = tpu.matmul %1, %0, %cst {dimension_numbers = #tpu.dot_dimension_numbers<[1], [0], [0], [1], [0, 0, 1, 1], [], []>} : vector<32x8xbf16>, vector<8x2xbf16>, vector<32x2xf32> -> vector<32x2xf32>
    %c0_3 = arith.constant 0 : index
    %c0_4 = arith.constant 0 : index
    %3 = vector.load %arg4[%c0_3, %c0_4] : memref<32x1xf32, #tpu.memory_space<vmem>>, vector<32x1xf32>
    %4 = vector.broadcast %3 : vector<32x1xf32> to vector<32x2xf32>
    %5 = arith.addf %2, %4 : vector<32x2xf32>
    %cst_5 = arith.constant 0.000000e+00 : f32
    %6 = vector.broadcast %cst_5 : f32 to vector<32x2xf32>
    %7 = arith.maximumf %5, %6 : vector<32x2xf32>
    %8 = arith.truncf %7 : vector<32x2xf32> to vector<32x2xbf16>
    %c0_6 = arith.constant 0 : index
    %c0_7 = arith.constant 0 : index
    %c0_8 = arith.constant 0 : index
    %9 = vector.load %arg5[%c0_6, %c0_7, %c0_8] : memref<1x32x32xbf16, #tpu.memory_space<vmem>>, vector<1x32x32xbf16>
    %10 = vector.shape_cast %9 : vector<1x32x32xbf16> to vector<32x32xbf16>
    %cst_9 = arith.constant dense<0.000000e+00> : vector<32x2xf32>
    %11 = tpu.matmul %10, %8, %cst_9 {dimension_numbers = #tpu.dot_dimension_numbers<[1], [0], [0], [1], [0, 0, 1, 1], [], []>} : vector<32x32xbf16>, vector<32x2xbf16>, vector<32x2xf32> -> vector<32x2xf32>
    %c0_10 = arith.constant 0 : index
    %c0_11 = arith.constant 0 : index
    %c0_12 = arith.constant 0 : index
    %12 = vector.load %arg6[%c0_10, %c0_11, %c0_12] : memref<1x32x1xf32, #tpu.memory_space<vmem>>, vector<1x32x1xf32>
    %13 = vector.shape_cast %12 : vector<1x32x1xf32> to vector<32x1xf32>
    %14 = vector.broadcast %13 : vector<32x1xf32> to vector<32x2xf32>
    %15 = arith.addf %11, %14 : vector<32x2xf32>
    %cst_13 = arith.constant 0.000000e+00 : f32
    %16 = vector.broadcast %cst_13 : f32 to vector<32x2xf32>
    %17 = arith.maximumf %15, %16 : vector<32x2xf32>
    %18 = arith.truncf %17 : vector<32x2xf32> to vector<32x2xbf16>
    %c0_14 = arith.constant 0 : index
    %c0_15 = arith.constant 0 : index
    %c0_16 = arith.constant 0 : index
    %19 = vector.load %arg7[%c0_14, %c0_15, %c0_16] : memref<1x8x32xbf16, #tpu.memory_space<vmem>>, vector<1x8x32xbf16>
    %20 = vector.shape_cast %19 : vector<1x8x32xbf16> to vector<8x32xbf16>
    %cst_17 = arith.constant dense<0.000000e+00> : vector<8x2xf32>
    %21 = tpu.matmul %20, %18, %cst_17 {dimension_numbers = #tpu.dot_dimension_numbers<[1], [0], [0], [1], [0, 0, 1, 1], [], []>} : vector<8x32xbf16>, vector<32x2xbf16>, vector<8x2xf32> -> vector<8x2xf32>
    %c0_18 = arith.constant 0 : index
    %c0_19 = arith.constant 0 : index
    %c0_20 = arith.constant 0 : index
    %22 = vector.load %arg8[%c0_18, %c0_19, %c0_20] : memref<1x8x1xf32, #tpu.memory_space<vmem>>, vector<1x8x1xf32>
    %23 = vector.shape_cast %22 : vector<1x8x1xf32> to vector<8x1xf32>
    %24 = vector.broadcast %23 : vector<8x1xf32> to vector<8x2xf32>
    %25 = arith.addf %21, %24 : vector<8x2xf32>
    %c0_21 = arith.constant 0 : index
    %c0_22 = arith.constant 0 : index
    %26 = vector.load %arg9[%c0_21, %c0_22] : memref<8x2xf32, #tpu.memory_space<vmem>>, vector<8x2xf32>
    tpu.vector_store %arg9[%c0_21, %c0_22], %25 {strides = array<i32>} : memref<8x2xf32, #tpu.memory_space<vmem>>, vector<8x2xf32>,
    return
  }
  func.func @transform_0(%arg0: i32, %arg1: memref<2xi32, #tpu.memory_space<smem>>) -> (i32, i32) {
    %c0_i32 = arith.constant 0 : i32
    %c0_i32_0 = arith.constant 0 : i32
    return %c0_i32, %arg0 : i32, i32
  }
  func.func @transform_1(%arg0: i32, %arg1: memref<2xi32, #tpu.memory_space<smem>>) -> (i32, i32) {
    %c0_i32 = arith.constant 0 : i32
    %c0_i32_0 = arith.constant 0 : i32
    %c0_i32_1 = arith.constant 0 : i32
    return %c0_i32, %c0_i32_0 : i32, i32
  }
  func.func @transform_2(%arg0: i32, %arg1: memref<2xi32, #tpu.memory_space<smem>>) -> (i32, i32) {
    %c0_i32 = arith.constant 0 : i32
    %c0_i32_0 = arith.constant 0 : i32
    %c0_i32_1 = arith.constant 0 : i32
    return %c0_i32, %c0_i32_0 : i32, i32
  }
  func.func @transform_3(%arg0: i32, %arg1: memref<2xi32, #tpu.memory_space<smem>>) -> (i32, i32, i32) {
    %c0 = arith.constant 0 : index
    %0 = memref.load %arg1[%c0] : memref<2xi32, #tpu.memory_space<smem>>
    %c0_i32 = arith.constant 0 : i32
    %c0_i32_0 = arith.constant 0 : i32
    %c0_i32_1 = arith.constant 0 : i32
    return %0, %c0_i32, %c0_i32_0 : i32, i32, i32
  }
  func.func @transform_4(%arg0: i32, %arg1: memref<2xi32, #tpu.memory_space<smem>>) -> (i32, i32, i32) {
    %c0 = arith.constant 0 : index
    %0 = memref.load %arg1[%c0] : memref<2xi32, #tpu.memory_space<smem>>
    %c0_i32 = arith.constant 0 : i32
    %c0_i32_0 = arith.constant 0 : i32
    %c0_i32_1 = arith.constant 0 : i32
    return %0, %c0_i32, %c0_i32_0 : i32, i32, i32
  }
  func.func @transform_5(%arg0: i32, %arg1: memref<2xi32, #tpu.memory_space<smem>>) -> (i32, i32, i32) {
    %c1 = arith.constant 1 : index
    %0 = memref.load %arg1[%c1] : memref<2xi32, #tpu.memory_space<smem>>
    %c0_i32 = arith.constant 0 : i32
    %c0_i32_0 = arith.constant 0 : i32
    %c0_i32_1 = arith.constant 0 : i32
    return %0, %c0_i32, %c0_i32_0 : i32, i32, i32
  }
  func.func @transform_6(%arg0: i32, %arg1: memref<2xi32, #tpu.memory_space<smem>>) -> (i32, i32, i32) {
    %c1 = arith.constant 1 : index
    %0 = memref.load %arg1[%c1] : memref<2xi32, #tpu.memory_space<smem>>
    %c0_i32 = arith.constant 0 : i32
    %c0_i32_0 = arith.constant 0 : i32
    %c0_i32_1 = arith.constant 0 : i32
    return %0, %c0_i32, %c0_i32_0 : i32, i32, i32
  }
  func.func @transform_7(%arg0: i32, %arg1: memref<2xi32, #tpu.memory_space<smem>>) -> (i32, i32) {
    %c0_i32 = arith.constant 0 : i32
    %c0_i32_0 = arith.constant 0 : i32
    return %c0_i32, %arg0 : i32, i32
  }
}

</mosaic_0001>

<bundles_post_ra>
// kernel: qnetwork_apply.1
= control target key start
LH: loop header
LB: loop body
LE: loop exit
PB: predicated region body
PF: predicated region fallthrough
CT: control target
= control target key end

     0   :  { %s364_s30 = smov [#allocation3]   ;;  %s463_s0 = inlined_call_operand.vmem [shape: s32[2], index: 0, kind: input, shape index: {}]   ;;  %s464_s1 = inlined_call_operand.vmem [shape: bf16[8,2], index: 1, kind: input, shape index: {}]   ;;  %s465_s2 = inlined_call_operand.vmem [shape: bf16[32,8], index: 2, kind: input, shape index: {}]   ;;  %s466_s3 = inlined_call_operand.vmem [shape: f32[32,1], index: 3, kind: input, shape index: {}]   ;;  %s467_s4 = inlined_call_operand.vmem [shape: bf16[2,32,32], index: 4, kind: input, shape index: {}]   ;;  %s468_s5 = inlined_call_operand.vmem [shape: f32[2,32,1], index: 5, kind: input, shape index: {}]   ;;  %s469_s6 = inlined_call_operand.vmem [shape: bf16[2,8,32], index: 6, kind: input, shape index: {}]   ;;  %s470_s7 = inlined_call_operand.vmem [shape: f32[2,8,1], index: 7, kind: input, shape index: {}]   ;;  %s471_s8 = inlined_call_operand.vmem [shape: f32[8,2], index: 8, kind: output, shape index: {}]  }
   0x1   :  { %s14_s29 = sshll.u32 %s463_s0, 4  ;;  %s15_s29 = int_to_ptr.vmem [resolvable:$true] %s14_s29 }
   0x2   :  { %17 = dma.vmem_to_smem %s15_s29, 16, %s364_s30, [#allocation2] }
   0x3   :  { %362 = dma.done.wait [#allocation2], 16 }
   0x4   :  { %363 = vsyncadd [#allocation2], 4294967280 }
   0x5   :  { %20 = sfence }
   0x6   :  { %v110_v0 = vld [vmem:[%s464_s1] sm:$0xf]  ;;  %vm156_vm0 = vcmask 1043456   ;;  %v365_v3 = vmov 0   ;;  %v117_v4 = vld [vmem:[%s466_s3 + $0x10] sm:$0xff]  ;;  %s90_s16 = sld [smem:[#allocation3]] }
   0x7   :  { %v158_v1 = vsel %vm156_vm0, %v110_v0, 0  ;;  %v339_v2 = vld [vmem:[%s465_s2] sm:$0xff]  ;;  %348 = vset.pattern.permute.xlu1 %v365_v3  ;;  %347 = vset.pattern.permute.xlu0 %v365_v3  ;;  %vm149_vm1 = vcmask 64512   ;;  %v118_v6 = vld [vmem:[%s466_s3 + $0x18] sm:$0xff]  ;;  %v116_v7 = vld [vmem:[%s466_s3 + $0x8] sm:$0xff]  ;;  %vm223_vm2 = vcmask 261120  }
   0x8   :  { %v115_v5 = vld [vmem:[%s466_s3] sm:$0xff]  ;;  %167 = vmatpush.bf16.msra.mxu0 %v158_v1  ;;  %131 = vperm.xlu0 %347, %v117_v4   ;;  %v340_v10 = vld [vmem:[%s465_s2 + $0x8] sm:$0xff]  ;;  %s314_s3 = sld [smem:[#allocation3 + $0x1]]  ;;  %vm278_vm3 = vcmask 15360  }
   0x9   :  { %121 = vperm.xlu1 %348, %v115_v5   ;;  %349 = vset.pattern.permute.xlu2 %v365_v3 }
   0xb   :  { %324 = vmatmul.msk.bf16.vlgmr.msra.gmra.mxu0 %vm149_vm1, %v339_v2 }
   0xc   :  { %p91_p0 = scmp.lt.s32.totalorder %s90_s16, 1 }
   0xe   :  { %s473_s16 = smov (!%p91_p0, %s90_s16), 1  ;;  %p104_p1 = scmp.lt.s32.totalorder %s314_s3, 1 }
   0xf   :  { %s338_s20 = sshll.u32 %s473_s16, 5  ;;  %s337_s28 = sshll.u32 %s473_s16, 4 }
  0x10   :  { %136 = vperm.xlu0 %347, %v118_v6   ;;  %s95_s23 = scalar_lea.vmem %s468_s5, %s338_s20  ;;  %s475_s3 = smov (!%p104_p1, %s314_s3), 1 }
  0x11   :  { %126 = vperm.xlu1 %348, %v116_v7   ;;  %v189_v8 = vld [vmem:[%s95_s23] sm:$0xff]  ;;  %v190_v9 = vld [vmem:[%s95_s23 + $0x8] sm:$0xff]  ;;  %v191_v12 = vld [vmem:[%s95_s23 + $0x10] sm:$0xff]  ;;  %s315_s5 = sshll.u32 %s475_s3, 3 }
  0x12   :  { %205 = vperm.xlu2 %349, %v191_v12   ;;  %v192_v15 = vld [vmem:[%s95_s23 + $0x18] sm:$0xff]  ;;  %s107_s27 = scalar_lea.vmem %s470_s7, %s315_s5  ;;  %s88_s7 = scalar_lea.vmem %s467_s4, %s337_s28 }
  0x13   :  { %v256_v18 = vld [vmem:[%s107_s27] sm:$0xff]  ;;  %v342_v33 = vld [vmem:[%s88_s7 + $0x8] sm:$0xff]  ;;  %s313_s4 = sshll.u32 %s475_s3, 2 }
  0x14   :  { %v341_v32 = vld [vmem:[%s88_s7] sm:$0xff]  ;;  %s101_s11 = scalar_lea.vmem %s469_s6, %s313_s4 }
  0x15   :  { %v255_v52 = vld [vmem:[%s101_s11] sm:$0xf] }
  0x18   :  { %195 = vperm.xlu0 %347, %v189_v8  }
  0x19   :  { %200 = vperm.xlu1 %348, %v190_v9  }
  0x1a   :  { %210 = vperm.xlu2 %349, %v192_v15  }
  0x1b   :  { %325 = vmatmul.msk.bf16.gmra.mxu0 %vm149_vm1, %v340_v10 }
  0x22   :  { %259 = vperm.xlu2 %349, %v256_v18  }
  0x6c   :  { %v206_v35 = vpop.permute.xlu2 %205 }
  0x74   :  { %v211_v40 = vpop.permute.xlu2 %210 }
  0x7a   :  { %v132_v16 = vpop.permute.xlu0 %131 }
  0x7b   :  { %v122_v14 = vpop.permute.xlu1 %121 }
  0x7c   :  { %v260_v53 = vpop.permute.xlu2 %259 }
  0x82   :  { %v137_v21 = vpop.permute.xlu0 %136 }
  0x83   :  { %v127_v19 = vpop.permute.xlu1 %126 }
  0x88   :  { %v169_v11 = vpop.f32.mrf.mxu0 }
  0x89   :  { %v170_v25 = vadd.f32 %v169_v11, %v122_v14 }
  0x8a   :  { %v196_v44 = vpop.permute.xlu0 %195 }
  0x8b   :  { %v179_v30 = vmax.f32 %v170_v25, 0.0  ;;  %v201_v38 = vpop.permute.xlu1 %200 }
  0x90   :  { %v171_v13 = vpop.f32.mrf.mxu0 }
  0x91   :  { %v172_v23 = vadd.f32 %v171_v13, %v127_v19 }
  0x93   :  { %v180_v28 = vmax.f32 %v172_v23, 0.0 }
  0x95   :  { %v183_v31 = vpack.c.bf16 %v180_v28, %v179_v30 }
  0x98   :  { %v174_v17 = vpop.f32.mrf.mxu0 }
  0x99   :  { %v175_v20 = vadd.f32 %v174_v17, %v132_v16 }
  0x9b   :  { %v181_v26 = vmax.f32 %v175_v20, 0.0 }
  0xa0   :  { %v176_v22 = vpop.f32.mrf.mxu0 }
  0xa1   :  { %v177_v24 = vadd.f32 %v176_v22, %v137_v21 }
  0xa3   :  { %v182_v27 = vmax.f32 %v177_v24, 0.0 }
  0xa5   :  { %v184_v29 = vpack.c.bf16 %v182_v27, %v181_v26 }
  0xa7   :  { %236 = vmatpush.bf16.msra.mxu1 %v184_v29  ;;  %343 = vmatpush.bf16.msra.mxu3 %v184_v29 }
  0xab   :  { %237 = vmatpush.bf16.msra.mxu1 %v183_v31  ;;  %344 = vmatpush.bf16.msra.mxu3 %v183_v31 }
  0xae   :  { %334 = vmatmul.msk.bf16.vlgmr.msra.gmra.mxu1 %vm223_vm2, %v341_v32  ;;  %335 = vmatmul.msk.bf16.vlgmr.msra.gmra.mxu3 %vm223_vm2, %v342_v33 }
 0x12b   :  { %v239_v34 = vpop.f32.mrf.mxu1 }
 0x12c   :  { %v240_v45 = vadd.f32 %v239_v34, %v196_v44 }
 0x12e   :  { %v249_v50 = vmax.f32 %v240_v45, 0.0 }
 0x131   :  { %v244_v36 = vpop.f32.mrf.mxu3 }
 0x132   :  { %v245_v39 = vadd.f32 %v244_v36, %v206_v35 }
 0x133   :  { %v241_v37 = vpop.f32.mrf.mxu1 }
 0x134   :  { %v242_v42 = vadd.f32 %v241_v37, %v201_v38  ;;  %v251_v46 = vmax.f32 %v245_v39, 0.0 }
 0x136   :  { %v250_v48 = vmax.f32 %v242_v42, 0.0 }
 0x138   :  { %v253_v51 = vpack.c.bf16 %v250_v48, %v249_v50 }
 0x139   :  { %v246_v41 = vpop.f32.mrf.mxu3 }
 0x13a   :  { %v247_v43 = vadd.f32 %v246_v41, %v211_v40 }
 0x13c   :  { %v252_v47 = vmax.f32 %v247_v43, 0.0 }
 0x13e   :  { %v254_v49 = vpack.c.bf16 %v252_v47, %v251_v46 }
 0x140   :  { %271 = vmatpush.bf16.msra.mxu2 %v254_v49 }
 0x144   :  { %272 = vmatpush.bf16.msra.mxu2 %v253_v51 }
 0x147   :  { %336 = vmatmul.msk.bf16.vlgmr.msra.gmra.mxu2 %vm223_vm2, %v255_v52 }
 0x1ca   :  { %v274_v54 = vpop.f32.mrf.mxu2 }
 0x1cb   :  { %v275_v55 = vadd.f32 %v274_v54, %v260_v53 }
 0x1cd   :  { %279 = vst.msk [vmem:[%s471_s8] sm:$0xff] %vm278_vm3, %v275_v55 }
 0x1d2   :  { %v276_v56 = vpop.f32.mrf.mxu2 }

</bundles_post_ra>
